<compile_context>
chip_gen: v5e
topology: v5e:2x2
jax: 0.10.0
libtpu: 0.0.40
codegen_flags: <defaults>
</compile_context>

<pallas_src>
import functools
import math

import jax
import jax.numpy as jnp
from jax.experimental import pallas as pl
from jax.experimental.pallas import tpu as pltpu

_LANE = 128


def _round_up(v, m):
    return ((v + m - 1) // m) * m


def _num_tensorcores():
    """Best-effort TensorCores-per-chip (v7x / v4-class megacore: 2, else 1)."""
    try:
        kind = jax.devices()[0].device_kind.lower()
    except Exception:
        return 1
    for tag in ("7", "v4", "v5p"):
        if tag in kind:
            return 2
    return 1


def _default_tile_b(batch, num_tc):
    # Single-TC chips (v5e/v6e): one big tile amortises the ~0.35us/step grid
    # overhead.  Dual-TC chips (v7x): at least `num_tc` grid steps so both
    # cores get work under dimension_semantics=("parallel",).
    b_lanes = _round_up(max(batch, 1), _LANE)
    tile = _round_up(pl.cdiv(b_lanes, num_tc), _LANE)
    return min(tile, 2048)   # activations are only hidden*tile*4 B per layer


# ---------------------------------------------------------------------------
# Activation (same formulas as the PyTorch module; used in kernel & reference)
# ---------------------------------------------------------------------------
def _activation(x, kind):
    if kind == "tanh":
        return jnp.tanh(x)
    if kind == "sigmoid":
        # Exact sigmoid (no approx reciprocal); exp runs on the EUP slot.
        return 1.0 / (1.0 + jnp.exp(-x))
    if kind == "GELU":
        a_value = 0.044715
        b_value = math.sqrt(2.0 / math.pi)
        x3 = x * x * x
        return 0.5 * x * (1.0 + jnp.tanh(b_value * (x + a_value * x3)))
    raise ValueError(f"unknown activation {kind!r}")


# ---------------------------------------------------------------------------
# Kernel
# ---------------------------------------------------------------------------
def mlp_kernel(x_ref, w_in_ref, w_hh_ref, b_h_ref, w_out_ref, b_out_ref,
               o_ref, *, num_hidden_layers, activation):
    d_in = x_ref.shape[0]

    # ---- Layer 1: z1 = W_in.T @ x.T + b_hidden[0][:, None] ----------------
    bias1 = b_h_ref[:, 0:1]                                   # (hidden, 1)
    if d_in <= 8:
        # K = d_in (=4) would badly under-fill the MXU; do d_in broadcast
        # FMAs on the VPU instead (the (d_in, tile_b) operand is lane-dense).
        z1 = bias1 + w_in_ref[:, 0:1] * x_ref[0:1, :]
        for k in range(1, d_in):
            z1 = z1 + w_in_ref[:, k:k + 1] * x_ref[k:k + 1, :]
    else:
        z1 = bias1 + jnp.dot(w_in_ref[...], x_ref[...],
                             preferred_element_type=jnp.float32)
    a_prev = _activation(z1, activation)

    # ---- Hidden -> hidden layers (statically unrolled, m = 2 .. L) --------
    for m in range(2, num_hidden_layers + 1):
        z_m = b_h_ref[:, m - 1:m] + jnp.dot(
            w_hh_ref[m - 2], a_prev, preferred_element_type=jnp.float32)
        a_prev = _activation(z_m, activation)

    # ---- Output layer: lane-dense (out_dim, tile_b) row; scalar bias (SMEM)
    o_ref[...] = (jnp.dot(w_out_ref[...], a_prev,
                          preferred_element_type=jnp.float32)
                  + b_out_ref[0, 0])


# ---------------------------------------------------------------------------
# One-time parameter prep (hoisted out of the per-call path)
# ---------------------------------------------------------------------------
def prepare_params(w_in, w_hh, b_hidden, w_out, b_out, dtype=jnp.float32):
    """Transpose parameters into the column-major kernel layout, once.

      W_in.T  : (hidden, d_in)     W_hh.T : (L-1, hidden, hidden)
      b_hid.T : (hidden, L+1)      W_out.T: (out, hidden)      b_out: (1, 1)

    No zero-padding is needed - all sizes are consumed as-is by the kernel.
    """
    hidden = w_in.shape[1]
    w_in_T = jnp.asarray(w_in, dtype).T
    if w_hh.shape[0] > 0:
        w_hh_T = jnp.swapaxes(jnp.asarray(w_hh, dtype), 1, 2)
    else:   # single-hidden-layer config: dummy slab, never read by the kernel
        w_hh_T = jnp.zeros((1, hidden, hidden), dtype)
    b_h_T = jnp.asarray(b_hidden, dtype).T
    w_out_T = jnp.asarray(w_out, dtype).T
    b_out_s = jnp.asarray(b_out, dtype).reshape(1, 1)
    return w_in_T, w_hh_T, b_h_T, w_out_T, b_out_s


# ---------------------------------------------------------------------------
# Wrapper
# ---------------------------------------------------------------------------
def mlp_forward(x, w_in_T, w_hh_T, b_h_T, w_out_T, b_out_s, *,
                num_hidden_layers, activation="tanh", tile_b=None):
    f32 = jnp.float32
    batch, d_in = x.shape
    hidden, d_in_w = w_in_T.shape
    assert d_in == d_in_w, (d_in, d_in_w)
    out_dim = w_out_T.shape[0]
    n_hh = w_hh_T.shape[0]
    n_bh = b_h_T.shape[1]

    if tile_b is None:
        tile_b = _default_tile_b(batch, _num_tensorcores())
    grid = (pl.cdiv(batch, tile_b),)

    # Column-major: batch rides the lane axis.  Only per-call prep is this
    # tiny (d_in, batch) transpose of x; weights were prepped once.
    x_T = jnp.asarray(x, f32).T

    kernel = functools.partial(mlp_kernel,
                               num_hidden_layers=num_hidden_layers,
                               activation=activation)

    y_cm = pl.pallas_call(
        kernel,
        out_shape=jax.ShapeDtypeStruct((out_dim, batch), f32),
        grid_spec=pltpu.PrefetchScalarGridSpec(
            num_scalar_prefetch=0,
            grid=grid,
            in_specs=[
                # x.T: tiled over batch (lane axis)
                pl.BlockSpec((d_in, tile_b), lambda i: (0, i)),
                # weights / hidden biases: full blocks, VMEM-resident
                pl.BlockSpec((hidden, d_in), lambda i: (0, 0)),
                pl.BlockSpec((n_hh, hidden, hidden), lambda i: (0, 0, 0)),
                pl.BlockSpec((hidden, n_bh), lambda i: (0, 0)),
                pl.BlockSpec((out_dim, hidden), lambda i: (0, 0)),
                # scalar output bias lives in SMEM
                pl.BlockSpec(memory_space=pltpu.MemorySpace.SMEM),
            ],
            out_specs=pl.BlockSpec((out_dim, tile_b), lambda i: (0, i)),
        ),
        compiler_params=pltpu.CompilerParams(
            dimension_semantics=("parallel",),   # megacore split on v7x
        ),
    )(x_T, w_in_T, w_hh_T, b_h_T, w_out_T, b_out_s)

    return y_cm.T        # (batch, out_dim), matching Y_output.T in the module


# ---------------------------------------------------------------------------
# Deterministic parameter construction (mirrors __init__ shapes / xavier init)
# ---------------------------------------------------------------------------
def xavier_initialisation(size_in, size_out, xavier_gain):
    return xavier_gain * math.sqrt(6.0 / (size_in + size_out))


def init_params(key, n_inputs, hidden, n_hidden_layers, out_size, xavier_gain):
    k1, k2, k3, k4, k5 = jax.random.split(key, 5)
    lim_in = xavier_initialisation(n_inputs, hidden, xavier_gain)
    lim_hh = xavier_initialisation(hidden, hidden, xavier_gain)
    lim_out = xavier_initialisation(hidden, out_size, xavier_gain)
    w_in = jax.random.uniform(k1, (n_inputs, hidden),
                              minval=-lim_in, maxval=lim_in, dtype=jnp.float32)
    w_hh = jax.random.uniform(k2, (n_hidden_layers - 1, hidden, hidden),
                              minval=-lim_hh, maxval=lim_hh, dtype=jnp.float32)
    w_out = jax.random.uniform(k3, (hidden, out_size),
                               minval=-lim_out, maxval=lim_out,
                               dtype=jnp.float32)
    # The module initializes these to zero; use small non-zero values here so
    # the bias paths of the kernel are actually exercised by the test.
    b_hidden = 0.01 * jax.random.normal(k4, (n_hidden_layers + 1, hidden),
                                        dtype=jnp.float32)
    b_out = 0.01 * jax.random.normal(k5, (1, 1), dtype=jnp.float32)
    return w_in, w_hh, b_hidden, w_out, b_out


# Pure-JAX reference of the PyTorch forward (column-major, transposed back)
def reference_forward(x, w_in, w_hh, b_hidden, w_out, b_out,
                      num_hidden_layers, activation="tanh"):
    z1 = jnp.matmul(w_in.T, x.T) + b_hidden[0][:, None]
    a_prev = _activation(z1, activation)
    for m in range(2, num_hidden_layers + 1):
        z_m = b_hidden[m - 1][:, None] + jnp.matmul(w_hh[m - 2].T, a_prev)
        a_prev = _activation(z_m, activation)
    y = jnp.matmul(w_out.T, a_prev) + b_out
    return y.T


# ---------------------------------------------------------------------------
if __name__ == "__main__":
    batch = 256
    n_inputs = 4
    hidden = 32
    n_hidden_layers = 3
    out_size = 1
    xavier_gain = 1.0

    key = jax.random.PRNGKey(0)
    k_x, k_p = jax.random.split(key)
    x = jax.random.normal(k_x, (batch, n_inputs), dtype=jnp.float32)
    w_in, w_hh, b_hidden, w_out, b_out = init_params(
        k_p, n_inputs, hidden, n_hidden_layers, out_size, xavier_gain)

    # One-time parameter prep (transposed column-major layout).
    params = prepare_params(w_in, w_hh, b_hidden, w_out, b_out)

    # Validate all three activation paths (tanh / sigmoid / GELU).
    for act in ("tanh", "sigmoid", "GELU"):
        y_ref = reference_forward(x, w_in, w_hh, b_hidden, w_out, b_out,
                                  n_hidden_layers, act)
        y = jax.block_until_ready(
            mlp_forward(x, *params, num_hidden_layers=n_hidden_layers,
                        activation=act))
        assert y.shape == (batch, out_size)
        err = float(jnp.max(jnp.abs(y - y_ref)))
        assert jnp.allclose(y, y_ref, atol=1e-4, rtol=1e-4), (act, err)

    # Ragged batch (not a multiple of the 128-lane tile): exercises the
    # un-padded pl.cdiv grid with a partial final block.
    batch2 = 200
    x2 = jax.random.normal(jax.random.PRNGKey(1), (batch2, n_inputs),
                           dtype=jnp.float32)
    y2_ref = reference_forward(x2, w_in, w_hh, b_hidden, w_out, b_out,
                               n_hidden_layers, "tanh")
    y2 = jax.block_until_ready(
        mlp_forward(x2, *params, num_hidden_layers=n_hidden_layers,
                    activation="tanh", tile_b=128))
    assert y2.shape == (batch2, out_size)
    err2 = float(jnp.max(jnp.abs(y2 - y2_ref)))
    assert jnp.allclose(y2, y2_ref, atol=1e-4, rtol=1e-4), err2

    print("KERNEL_OK")
</pallas_src>

<mosaic_0001>
module attributes {stable_mosaic.version = 11 : i64} {
  func.func @mlp_kernel(%arg0: i32, %arg1: memref<4x256xf32, #tpu.memory_space<vmem>>, %arg2: memref<32x4xf32, #tpu.memory_space<vmem>>, %arg3: memref<2x32x32xf32, #tpu.memory_space<vmem>>, %arg4: memref<32x4xf32, #tpu.memory_space<vmem>>, %arg5: memref<1x32xf32, #tpu.memory_space<vmem>>, %arg6: memref<1x1xf32, #tpu.memory_space<smem>>, %arg7: memref<1x256xf32, #tpu.memory_space<vmem>>) attributes {dimension_semantics = [#tpu.dimension_semantics<parallel>], iteration_bounds = array<i64: 1>, scalar_prefetch = 0 : i64, scratch_operands = 0 : i64, tpu.core_type = #tpu.core_type<tc>, window_params = [{transform_indices = @transform_0, window_bounds = array<i64: 4, 256>}, {pipeline_mode = #tpu.pipeline_mode<synchronous>, transform_indices = @transform_1, window_bounds = array<i64: 32, 4>}, {pipeline_mode = #tpu.pipeline_mode<synchronous>, transform_indices = @transform_2, window_bounds = array<i64: 2, 32, 32>}, {pipeline_mode = #tpu.pipeline_mode<synchronous>, transform_indices = @transform_3, window_bounds = array<i64: 32, 4>}, {pipeline_mode = #tpu.pipeline_mode<synchronous>, transform_indices = @transform_4, window_bounds = array<i64: 1, 32>}, {transform_indices = @transform_5, window_bounds = array<i64: 1, 1>}, {transform_indices = @transform_6, window_bounds = array<i64: 1, 256>}]} {
    %c0 = arith.constant 0 : index
    %c0_0 = arith.constant 0 : index
    %0 = vector.load %arg4[%c0, %c0_0] : memref<32x4xf32, #tpu.memory_space<vmem>>, vector<32x1xf32>
    %c0_1 = arith.constant 0 : index
    %c0_2 = arith.constant 0 : index
    %1 = vector.load %arg2[%c0_1, %c0_2] : memref<32x4xf32, #tpu.memory_space<vmem>>, vector<32x1xf32>
    %c0_3 = arith.constant 0 : index
    %c0_4 = arith.constant 0 : index
    %2 = vector.load %arg1[%c0_3, %c0_4] : memref<4x256xf32, #tpu.memory_space<vmem>>, vector<1x256xf32>
    %3 = vector.broadcast %1 : vector<32x1xf32> to vector<32x256xf32>
    %4 = vector.broadcast %2 : vector<1x256xf32> to vector<32x256xf32>
    %5 = arith.mulf %3, %4 : vector<32x256xf32>
    %6 = vector.broadcast %0 : vector<32x1xf32> to vector<32x256xf32>
    %7 = arith.addf %6, %5 : vector<32x256xf32>
    %c0_5 = arith.constant 0 : index
    %c1 = arith.constant 1 : index
    %8 = vector.load %arg2[%c0_5, %c1] : memref<32x4xf32, #tpu.memory_space<vmem>>, vector<32x1xf32>
    %c1_6 = arith.constant 1 : index
    %c0_7 = arith.constant 0 : index
    %9 = vector.load %arg1[%c1_6, %c0_7] : memref<4x256xf32, #tpu.memory_space<vmem>>, vector<1x256xf32>
    %10 = vector.broadcast %8 : vector<32x1xf32> to vector<32x256xf32>
    %11 = vector.broadcast %9 : vector<1x256xf32> to vector<32x256xf32>
    %12 = arith.mulf %10, %11 : vector<32x256xf32>
    %13 = arith.addf %7, %12 : vector<32x256xf32>
    %c0_8 = arith.constant 0 : index
    %c2 = arith.constant 2 : index
    %14 = vector.load %arg2[%c0_8, %c2] : memref<32x4xf32, #tpu.memory_space<vmem>>, vector<32x1xf32>
    %c2_9 = arith.constant 2 : index
    %c0_10 = arith.constant 0 : index
    %15 = vector.load %arg1[%c2_9, %c0_10] : memref<4x256xf32, #tpu.memory_space<vmem>>, vector<1x256xf32>
    %16 = vector.broadcast %14 : vector<32x1xf32> to vector<32x256xf32>
    %17 = vector.broadcast %15 : vector<1x256xf32> to vector<32x256xf32>
    %18 = arith.mulf %16, %17 : vector<32x256xf32>
    %19 = arith.addf %13, %18 : vector<32x256xf32>
    %c0_11 = arith.constant 0 : index
    %c3 = arith.constant 3 : index
    %20 = vector.load %arg2[%c0_11, %c3] : memref<32x4xf32, #tpu.memory_space<vmem>>, vector<32x1xf32>
    %c3_12 = arith.constant 3 : index
    %c0_13 = arith.constant 0 : index
    %21 = vector.load %arg1[%c3_12, %c0_13] : memref<4x256xf32, #tpu.memory_space<vmem>>, vector<1x256xf32>
    %22 = vector.broadcast %20 : vector<32x1xf32> to vector<32x256xf32>
    %23 = vector.broadcast %21 : vector<1x256xf32> to vector<32x256xf32>
    %24 = arith.mulf %22, %23 : vector<32x256xf32>
    %25 = arith.addf %19, %24 : vector<32x256xf32>
    %26 = math.tanh %25 : vector<32x256xf32>
    %c0_14 = arith.constant 0 : index
    %c1_15 = arith.constant 1 : index
    %27 = vector.load %arg4[%c0_14, %c1_15] : memref<32x4xf32, #tpu.memory_space<vmem>>, vector<32x1xf32>
    %c0_16 = arith.constant 0 : index
    %c0_17 = arith.constant 0 : index
    %c0_18 = arith.constant 0 : index
    %28 = vector.load %arg3[%c0_16, %c0_17, %c0_18] : memref<2x32x32xf32, #tpu.memory_space<vmem>>, vector<1x32x32xf32>
    %29 = vector.shape_cast %28 : vector<1x32x32xf32> to vector<32x32xf32>
    %cst = arith.constant dense<0.000000e+00> : vector<32x256xf32>
    %30 = tpu.matmul %29, %26, %cst {dimension_numbers = #tpu.dot_dimension_numbers<[1], [0], [0], [1], [0, 0, 1, 1], [], []>} : vector<32x32xf32>, vector<32x256xf32>, vector<32x256xf32> -> vector<32x256xf32>
    %31 = vector.broadcast %27 : vector<32x1xf32> to vector<32x256xf32>
    %32 = arith.addf %31, %30 : vector<32x256xf32>
    %33 = math.tanh %32 : vector<32x256xf32>
    %c0_19 = arith.constant 0 : index
    %c2_20 = arith.constant 2 : index
    %34 = vector.load %arg4[%c0_19, %c2_20] : memref<32x4xf32, #tpu.memory_space<vmem>>, vector<32x1xf32>
    %c1_21 = arith.constant 1 : index
    %c0_22 = arith.constant 0 : index
    %c0_23 = arith.constant 0 : index
    %35 = vector.load %arg3[%c1_21, %c0_22, %c0_23] : memref<2x32x32xf32, #tpu.memory_space<vmem>>, vector<1x32x32xf32>
    %36 = vector.shape_cast %35 : vector<1x32x32xf32> to vector<32x32xf32>
    %cst_24 = arith.constant dense<0.000000e+00> : vector<32x256xf32>
    %37 = tpu.matmul %36, %33, %cst_24 {dimension_numbers = #tpu.dot_dimension_numbers<[1], [0], [0], [1], [0, 0, 1, 1], [], []>} : vector<32x32xf32>, vector<32x256xf32>, vector<32x256xf32> -> vector<32x256xf32>
    %38 = vector.broadcast %34 : vector<32x1xf32> to vector<32x256xf32>
    %39 = arith.addf %38, %37 : vector<32x256xf32>
    %40 = math.tanh %39 : vector<32x256xf32>
    %c0_25 = arith.constant 0 : index
    %c0_26 = arith.constant 0 : index
    %41 = vector.load %arg5[%c0_25, %c0_26] : memref<1x32xf32, #tpu.memory_space<vmem>>, vector<1x32xf32>
    %cst_27 = arith.constant dense<0.000000e+00> : vector<1x256xf32>
    %42 = tpu.matmul %41, %40, %cst_27 {dimension_numbers = #tpu.dot_dimension_numbers<[1], [0], [0], [1], [0, 0, 1, 1], [], []>} : vector<1x32xf32>, vector<32x256xf32>, vector<1x256xf32> -> vector<1x256xf32>
    %c0_28 = arith.constant 0 : index
    %c0_29 = arith.constant 0 : index
    %43 = memref.load %arg6[%c0_28, %c0_29] : memref<1x1xf32, #tpu.memory_space<smem>>
    %44 = vector.broadcast %43 : f32 to vector<1x256xf32>
    %45 = arith.addf %42, %44 : vector<1x256xf32>
    %c0_30 = arith.constant 0 : index
    %c0_31 = arith.constant 0 : index
    %46 = vector.load %arg7[%c0_30, %c0_31] : memref<1x256xf32, #tpu.memory_space<vmem>>, vector<1x256xf32>
    tpu.vector_store %arg7[%c0_30, %c0_31], %45 {strides = array<i32>} : memref<1x256xf32, #tpu.memory_space<vmem>>, vector<1x256xf32>,
    return
  }
  func.func @transform_0(%arg0: i32) -> (i32, i32) {
    %c0_i32 = arith.constant 0 : i32
    %c0_i32_0 = arith.constant 0 : i32
    return %c0_i32, %arg0 : i32, i32
  }
  func.func @transform_1(%arg0: i32) -> (i32, i32) {
    %c0_i32 = arith.constant 0 : i32
    %c0_i32_0 = arith.constant 0 : i32
    %c0_i32_1 = arith.constant 0 : i32
    return %c0_i32, %c0_i32_0 : i32, i32
  }
  func.func @transform_2(%arg0: i32) -> (i32, i32, i32) {
    %c0_i32 = arith.constant 0 : i32
    %c0_i32_0 = arith.constant 0 : i32
    %c0_i32_1 = arith.constant 0 : i32
    %c0_i32_2 = arith.constant 0 : i32
    return %c0_i32, %c0_i32_0, %c0_i32_1 : i32, i32, i32
  }
  func.func @transform_3(%arg0: i32) -> (i32, i32) {
    %c0_i32 = arith.constant 0 : i32
    %c0_i32_0 = arith.constant 0 : i32
    %c0_i32_1 = arith.constant 0 : i32
    return %c0_i32, %c0_i32_0 : i32, i32
  }
  func.func @transform_4(%arg0: i32) -> (i32, i32) {
    %c0_i32 = arith.constant 0 : i32
    %c0_i32_0 = arith.constant 0 : i32
    %c0_i32_1 = arith.constant 0 : i32
    return %c0_i32, %c0_i32_0 : i32, i32
  }
  func.func @transform_5(%arg0: i32) -> (i32, i32) {
    %c0_i32 = arith.constant 0 : i32
    %c0_i32_0 = arith.constant 0 : i32
    %c0_i32_1 = arith.constant 0 : i32
    return %c0_i32, %c0_i32_0 : i32, i32
  }
  func.func @transform_6(%arg0: i32) -> (i32, i32) {
    %c0_i32 = arith.constant 0 : i32
    %c0_i32_0 = arith.constant 0 : i32
    return %c0_i32, %arg0 : i32, i32
  }
}

</mosaic_0001>

<bundles_post_ra>
// kernel: tpu_custom_call.1
= control target key start
LH: loop header
LB: loop body
LE: loop exit
PB: predicated region body
PF: predicated region fallthrough
CT: control target
= control target key end

     0   :  { %12 = vsyncpa [#allocation4], 0  ;;  %s848_s0 = inlined_call_operand.hbm [shape: f32[4,256], index: 0, kind: input, shape index: {}]   ;;  %s849_s1 = inlined_call_operand.vmem [shape: f32[32,4], index: 1, kind: input, shape index: {}]   ;;  %s850_s2 = inlined_call_operand.vmem [shape: f32[2,32,32], index: 2, kind: input, shape index: {}]   ;;  %s851_s3 = inlined_call_operand.vmem [shape: f32[32,4], index: 3, kind: input, shape index: {}]   ;;  %s852_s4 = inlined_call_operand.vmem [shape: f32[1,32], index: 4, kind: input, shape index: {}]   ;;  %s853_s5 = inlined_call_operand.<no memory space> [shape: f32[1,1], index: 5, kind: input, shape index: {}]   ;;  %s854_s6 = inlined_call_operand.hbm [shape: f32[1,256], index: 6, kind: output, shape index: {}]  }
   0x1   :  { %13 = vsyncpa [#allocation5], 0  ;;  %s19_s23 = sshll.u32 %s848_s0, 4  ;;  %s673_s24 = smov [#allocation3]   ;;  %s20_s23 = int_to_ptr.hbm [resolvable:$true] %s19_s23 }
   0x2   :  { %s21_s25 = sshll.u32 %s673_s24, 4  ;;  %s22_s25 = int_to_ptr.vmem [resolvable:$true] %s21_s25 }
   0x3   :  { %24 = dma.hbm_to_vmem [thread:$0]  %s20_s23, 128, %s22_s25, [#allocation4]  }
   0x4   :  { %669 = dma.done.wait [#allocation4], 128  }
   0x5   :  { %670 = vsyncadd [#allocation4], 4294967168  ;;  %v674_v0 = vmov 0   ;;  %v46_v1 = vld [vmem:[%s849_s1 + $0x18] sm:$0xff]  ;;  %v44_v3 = vld [vmem:[%s849_s1 + $0x8] sm:$0xff]  ;;  %v675_v6 = vmov 1  }
   0x6   :  { %551 = vset.pattern.permute.xlu1 %v674_v0  ;;  %550 = vset.pattern.permute.xlu0 %v674_v0  ;;  %v42_v2 = vld [vmem:[%s851_s3 + $0x18] sm:$0xff]  ;;  %v45_v4 = vld [vmem:[%s849_s1 + $0x10] sm:$0xff]  ;;  %v43_v7 = vld [vmem:[%s849_s1] sm:$0xff]  ;;  %v676_v8 = vmov 2   ;;  %v677_v11 = vmov 3   ;;  %vm238_vm0 = vcmask 261120  }
   0x7   :  { %553 = vset.pattern.permute.xlu2 %v674_v0  ;;  %65 = vperm.xlu0 %550, %v46_v1   ;;  %v41_v5 = vld [vmem:[%s851_s3 + $0x10] sm:$0xff]  ;;  %v40_v9 = vld [vmem:[%s851_s3 + $0x8] sm:$0xff]  ;;  %v39_v10 = vld [vmem:[%s851_s3] sm:$0xff]  ;;  %s678_s9 = smov [#allocation6]   ;;  %s512_s12 = sshll.u32 %s854_s6, 4  ;;  %vm497_vm1 = vcmask 1040384   ;;  %s513_s12 = int_to_ptr.hbm [resolvable:$true] %s512_s12 }
   0x8   :  { %98 = vperm.xlu1 %551, %v42_v2   ;;  %55 = vperm.xlu2 %553, %v44_v3   ;;  %v47_v23 = vld [vmem:[#allocation3] ss:$4 sm:$0x3]  ;;  %v110_v24 = vld [vmem:[#allocation3 + $0x1] ss:$4 sm:$0x3] }
   0x9   :  { %v745_v25 = vperm.slane %v47_v23, 0  ;;  %v747_v26 = vperm.slane %v47_v23, 1  ;;  %v749_v28 = vperm.slane %v110_v24, 0  ;;  %v149_v29 = vld [vmem:[#allocation3 + $0x2] ss:$4 sm:$0x3] }
   0xa   :  { %v751_v31 = vperm.slane %v110_v24, 1  ;;  %v188_v32 = vld [vmem:[#allocation3 + $0x3] ss:$4 sm:$0x3]  ;;  %v759_v40 = vperm.slane %v149_v29, 0  ;;  %v761_v41 = vperm.slane %v149_v29, 1 }
   0xb   :  { %v765_v45 = vperm.slane %v188_v32, 0  ;;  %v769_v49 = vperm.slane %v188_v32, 1  ;;  %s510_s10 = sshll.u32 %s678_s9, 4  ;;  %s511_s10 = int_to_ptr.vmem [resolvable:$true] %s510_s10 }
   0xf   :  { %60 = vperm.xlu0 %550, %v45_v4  }
  0x10   :  { %552 = vset.pattern.permute.xlu1 %v675_v6  ;;  %93 = vperm.xlu2 %553, %v41_v5  }
  0x11   :  { %124 = vperm.xlu1 %552, %v46_v1  }
  0x17   :  { %554 = vset.pattern.permute.xlu0 %v675_v6 }
  0x18   :  { %120 = vperm.xlu0 %554, %v45_v4   ;;  %50 = vperm.xlu2 %553, %v43_v7  }
  0x19   :  { %555 = vset.pattern.permute.xlu1 %v676_v8 }
  0x1a   :  { %163 = vperm.xlu1 %555, %v46_v1  }
  0x20   :  { %558 = vset.pattern.permute.xlu0 %v676_v8  ;;  %557 = vset.pattern.permute.xlu2 %v675_v6 }
  0x21   :  { %159 = vperm.xlu0 %558, %v45_v4   ;;  %116 = vperm.xlu2 %557, %v44_v3  }
  0x22   :  { %556 = vset.pattern.permute.xlu1 %v674_v0 }
  0x23   :  { %88 = vperm.xlu1 %556, %v40_v9  }
  0x29   :  { %563 = vset.pattern.permute.xlu0 %v677_v11  ;;  %560 = vset.pattern.permute.xlu2 %v674_v0 }
  0x2a   :  { %198 = vperm.xlu0 %563, %v45_v4   ;;  %83 = vperm.xlu2 %560, %v39_v10  }
  0x2b   :  { %559 = vset.pattern.permute.xlu1 %v677_v11 }
  0x2c   :  { %202 = vperm.xlu1 %559, %v46_v1  }
  0x32   :  { %568 = vset.pattern.permute.xlu0 %v675_v6  ;;  %562 = vset.pattern.permute.xlu2 %v676_v8 }
  0x33   :  { %318 = vperm.xlu0 %568, %v41_v5   ;;  %155 = vperm.xlu2 %562, %v44_v3  }
  0x34   :  { %561 = vset.pattern.permute.xlu1 %v675_v6 }
  0x35   :  { %112 = vperm.xlu1 %561, %v43_v7  }
  0x3b   :  { %572 = vset.pattern.permute.xlu0 %v676_v8  ;;  %565 = vset.pattern.permute.xlu2 %v677_v11 }
  0x3c   :  { %421 = vperm.xlu0 %572, %v40_v9   ;;  %194 = vperm.xlu2 %565, %v44_v3  }
  0x3d   :  { %564 = vset.pattern.permute.xlu1 %v676_v8 }
  0x3e   :  { %151 = vperm.xlu1 %564, %v43_v7  }
  0x44   :  { %567 = vset.pattern.permute.xlu2 %v675_v6 }
  0x45   :  { %322 = vperm.xlu2 %567, %v42_v2  }
  0x46   :  { %566 = vset.pattern.permute.xlu1 %v677_v11 }
  0x47   :  { %190 = vperm.xlu1 %566, %v43_v7  }
  0x4d   :  { %310 = vperm.xlu2 %567, %v39_v10  }
  0x4f   :  { %569 = vset.pattern.permute.xlu1 %v675_v6 }
  0x50   :  { %314 = vperm.xlu1 %569, %v40_v9  }
  0x55   :  { %571 = vset.pattern.permute.xlu2 %v676_v8 }
  0x56   :  { %425 = vperm.xlu2 %571, %v41_v5  }
  0x58   :  { %570 = vset.pattern.permute.xlu1 %v676_v8 }
  0x59   :  { %429 = vperm.xlu1 %570, %v42_v2  }
  0x61   :  { %417 = vperm.xlu1 %570, %v39_v10  }
  0x62   :  { %v56_v12 = vpop.permute.xlu2 %55 }
  0x63   :  { %v75_v33 = vmul.f32 %v745_v25, %v56_v12  ;;  %v76_v38 = vmul.f32 %v747_v26, %v56_v12 }
  0x6a   :  { %v94_v13 = vpop.permute.xlu2 %93 }
  0x72   :  { %v741_v14 = vpop.permute.xlu2 %50 }
  0x79   :  { %v66_v15 = vpop.permute.xlu0 %65 }
  0x7a   :  { %v99_v16 = vpop.permute.xlu1 %98  ;;  %v79_v34 = vmul.f32 %v745_v25, %v66_v15  ;;  %v80_v35 = vmul.f32 %v747_v26, %v66_v15 }
  0x7b   :  { %v117_v17 = vpop.permute.xlu2 %116 }
  0x7c   :  { %v134_v42 = vmul.f32 %v749_v28, %v117_v17  ;;  %v135_v46 = vmul.f32 %v751_v31, %v117_v17  ;;  %v107_v50 = vadd.f32 %v99_v16, %v79_v34  ;;  %v108_v51 = vadd.f32 %v99_v16, %v80_v35 }
  0x81   :  { %v61_v18 = vpop.permute.xlu0 %60 }
  0x82   :  { %v77_v36 = vmul.f32 %v745_v25, %v61_v18  ;;  %v78_v39 = vmul.f32 %v747_v26, %v61_v18 }
  0x83   :  { %v125_v19 = vpop.permute.xlu1 %124 }
  0x84   :  { %v743_v20 = vpop.permute.xlu2 %83  ;;  %v138_v43 = vmul.f32 %v749_v28, %v125_v19  ;;  %v139_v47 = vmul.f32 %v751_v31, %v125_v19  ;;  %v105_v52 = vadd.f32 %v94_v13, %v77_v36  ;;  %v106_v54 = vadd.f32 %v94_v13, %v78_v39 }
  0x85   :  { %v73_v39 = vmul.f32 %v745_v25, %v741_v14 }
  0x86   :  { %v146_v58 = vadd.f32 %v138_v43, %v107_v50  ;;  %v147_v62 = vadd.f32 %v139_v47, %v108_v51 }
  0x8a   :  { %v121_v21 = vpop.permute.xlu0 %120 }
  0x8b   :  { %v136_v53 = vmul.f32 %v749_v28, %v121_v21  ;;  %v137_v55 = vmul.f32 %v751_v31, %v121_v21 }
  0x8c   :  { %v164_v22 = vpop.permute.xlu1 %163 }
  0x8d   :  { %v156_v27 = vpop.permute.xlu2 %155  ;;  %v177_v56 = vmul.f32 %v759_v40, %v164_v22  ;;  %v178_v57 = vmul.f32 %v761_v41, %v164_v22  ;;  %v144_v4 = vadd.f32 %v136_v53, %v105_v52  ;;  %v145_v6 = vadd.f32 %v137_v55, %v106_v54 }
  0x8e   :  { %v173_v59 = vmul.f32 %v759_v40, %v156_v27  ;;  %v174_v63 = vmul.f32 %v761_v41, %v156_v27 }
  0x8f   :  { %v185_v9 = vadd.f32 %v177_v56, %v146_v58  ;;  %v186_v10 = vadd.f32 %v178_v57, %v147_v62 }
  0x93   :  { %v160_v30 = vpop.permute.xlu0 %159 }
  0x94   :  { %v175_v60 = vmul.f32 %v759_v40, %v160_v30  ;;  %v176_v0 = vmul.f32 %v761_v41, %v160_v30 }
  0x95   :  { %v89_v37 = vpop.permute.xlu1 %88 }
  0x96   :  { %v103_v44 = vadd.f32 %v89_v37, %v75_v33  ;;  %v104_v48 = vadd.f32 %v89_v37, %v76_v38  ;;  %v195_v2 = vpop.permute.xlu2 %194  ;;  %v183_v11 = vadd.f32 %v175_v60, %v144_v4  ;;  %v184_v16 = vadd.f32 %v176_v0, %v145_v6 }
  0x97   :  { %v212_v13 = vmul.f32 %v765_v45, %v195_v2  ;;  %v213_v18 = vmul.f32 %v769_v49, %v195_v2 }
  0x98   :  { %v142_v61 = vadd.f32 %v134_v42, %v103_v44  ;;  %v143_v1 = vadd.f32 %v135_v46, %v104_v48  ;;  %v74_v42 = vmul.f32 %v747_v26, %v741_v14  ;;  %v101_v46 = vadd.f32 %v743_v20, %v73_v39 }
  0x9a   :  { %v181_v12 = vadd.f32 %v173_v59, %v142_v61  ;;  %v182_v17 = vadd.f32 %v174_v63, %v143_v1  ;;  %v102_v47 = vadd.f32 %v743_v20, %v74_v42  ;;  %v234_v20 = vld [vmem:[%s850_s2] sm:$0xff] }
  0x9c   :  { %v199_v3 = vpop.permute.xlu0 %198  ;;  %v220_v27 = vadd.f32 %v212_v13, %v181_v12  ;;  %v221_v29 = vadd.f32 %v213_v18, %v182_v17 }
  0x9d   :  { %v214_v5 = vmul.f32 %v765_v45, %v199_v3  ;;  %v215_v7 = vmul.f32 %v769_v49, %v199_v3 }
  0x9e   :  { %v203_v8 = vpop.permute.xlu1 %202 }
  0x9f   :  { %v216_v15 = vmul.f32 %v765_v45, %v203_v8  ;;  %v217_v19 = vmul.f32 %v769_v49, %v203_v8  ;;  %v222_v21 = vadd.f32 %v214_v5, %v183_v11  ;;  %v223_v23 = vadd.f32 %v215_v7, %v184_v16  ;;  %v323_v61 = vpop.permute.xlu2 %322 }
  0xa1   :  { %v224_v22 = vadd.f32 %v216_v15, %v185_v9  ;;  %v225_v24 = vadd.f32 %v217_v19, %v186_v10  ;;  %v530_v19 = vld [vmem:[%s850_s2 + $0x20] sm:$0xff] }
  0xa3   :  { %573 = vtanh.f32 %v224_v22 }
  0xa4   :  { %575 = vtanh.f32 %v225_v24  ;;  %v532_v24 = vld [vmem:[%s850_s2 + $0x30] sm:$0xff] }
  0xa5   :  { %577 = vtanh.f32 %v222_v21  ;;  %v319_v63 = vpop.permute.xlu0 %318 }
  0xa6   :  { %579 = vtanh.f32 %v223_v23  ;;  %v531_v23 = vld [vmem:[%s850_s2 + $0x28] sm:$0xff] }
  0xa7   :  { %581 = vtanh.f32 %v220_v27  ;;  %v113_v30 = vpop.permute.xlu1 %112  ;;  %v311_v7 = vpop.permute.xlu2 %310  ;;  %v533_v27 = vld [vmem:[%s850_s2 + $0x38] sm:$0xff] }
  0xa8   :  { %583 = vtanh.f32 %v221_v29  ;;  %v132_v43 = vmul.f32 %v749_v28, %v113_v30  ;;  %v133_v44 = vmul.f32 %v751_v31, %v113_v30 }
  0xa9   :  { %v574_v32 = vpop.eup %573 }
  0xaa   :  { %v576_v33 = vpop.eup %575  ;;  %263 = vmatpush.msra.mxu0 %v574_v32  ;;  %v140_v51 = vadd.f32 %v132_v43, %v101_v46  ;;  %v141_v52 = vadd.f32 %v133_v44, %v102_v47 }
  0xab   :  { %v578_v34 = vpop.eup %577  ;;  %292 = vmatpush.msra.mxu1 %v576_v33 }
  0xac   :  { %v580_v35 = vpop.eup %579  ;;  %264 = vmatpush.msra.mxu0 %v578_v34 }
  0xad   :  { %v582_v36 = vpop.eup %581  ;;  %293 = vmatpush.msra.mxu1 %v580_v35 }
  0xae   :  { %v584_v37 = vpop.eup %583  ;;  %265 = vmatpush.msra.mxu0 %v582_v36  ;;  %v422_v39 = vpop.permute.xlu0 %421 }
  0xaf   :  { %294 = vmatpush.msra.mxu1 %v584_v37 }
  0xb0   :  { %v152_v38 = vpop.permute.xlu1 %151  ;;  %v426_v37 = vpop.permute.xlu2 %425 }
  0xb1   :  { %v171_v48 = vmul.f32 %v759_v40, %v152_v38  ;;  %v172_v50 = vmul.f32 %v761_v41, %v152_v38  ;;  %v235_v41 = vld [vmem:[%s850_s2 + $0x8] sm:$0xff] }
  0xb3   :  { %v179_v54 = vadd.f32 %v171_v48, %v140_v51  ;;  %v180_v25 = vadd.f32 %v172_v50, %v141_v52 }
  0xb9   :  { %v191_v53 = vpop.permute.xlu1 %190 }
  0xba   :  { %v210_v55 = vmul.f32 %v765_v45, %v191_v53  ;;  %v211_v14 = vmul.f32 %v769_v49, %v191_v53  ;;  %v236_v45 = vld [vmem:[%s850_s2 + $0x10] sm:$0xff]  ;;  %v237_v49 = vld [vmem:[%s850_s2 + $0x18] sm:$0xff] }
  0xbc   :  { %v218_v26 = vadd.f32 %v210_v55, %v179_v54  ;;  %v219_v28 = vadd.f32 %v211_v14, %v180_v25 }
  0xbe   :  { %585 = vtanh.f32 %v218_v26 }
  0xbf   :  { %587 = vtanh.f32 %v219_v28 }
  0xc2   :  { %v315_v1 = vpop.permute.xlu1 %314 }
  0xc4   :  { %v586_v31 = vpop.eup %585 }
  0xc5   :  { %v588_v40 = vpop.eup %587  ;;  %266 = vmatpush.msra.mxu0 %v586_v31  ;;  %v448_v31 = vld [vmem:[%s852_s4] sm:$0x1] }
  0xc6   :  { %295 = vmatpush.msra.mxu1 %v588_v40  ;;  %522 = vmatmul.msk.f32.vlgmr.msra.gmra.mxu0 %vm238_vm0, %v234_v20 }
  0xc7   :  { %526 = vmatmul.msk.f32.vlgmr.msra.gmra.mxu1 %vm238_vm0, %v234_v20 }
  0xcb   :  { %v430_v35 = vpop.permute.xlu1 %429 }
  0xce   :  { %523 = vmatmul.msk.f32.gmra.mxu0 %vm238_vm0, %v235_v41 }
  0xcf   :  { %527 = vmatmul.msk.f32.gmra.mxu1 %vm238_vm0, %v235_v41  ;;  %v450_v41 = vstv %s853_s5 }
  0xd3   :  { %v418_v48 = vpop.permute.xlu1 %417 }
  0xd6   :  { %524 = vmatmul.msk.f32.gmra.mxu0 %vm238_vm0, %v236_v45 }
  0xd7   :  { %528 = vmatmul.msk.f32.gmra.mxu1 %vm238_vm0, %v236_v45 }
  0xde   :  { %525 = vmatmul.msk.f32.gmra.mxu0 %vm238_vm0, %v237_v49 }
  0xdf   :  { %529 = vmatmul.msk.f32.gmra.mxu1 %vm238_vm0, %v237_v49  ;;  %v500_v49 = vlaneseq }
  0xe1   :  { %vm502_vm2 = vcmp.lt.s32.totalorder %v500_v49, 256 }
 0x143   :  { %v268_v56 = vpop.f32.mrf.mxu0 }
 0x144   :  { %v297_v57 = vpop.f32.mrf.mxu1  ;;  %v325_v10 = vadd.f32 %v311_v7, %v268_v56 }
 0x145   :  { %v326_v11 = vadd.f32 %v311_v7, %v297_v57 }
 0x14b   :  { %v271_v58 = vpop.f32.mrf.mxu0 }
 0x14c   :  { %v300_v59 = vpop.f32.mrf.mxu1  ;;  %v327_v8 = vadd.f32 %v315_v1, %v271_v58 }
 0x14d   :  { %v328_v9 = vadd.f32 %v315_v1, %v300_v59 }
 0x153   :  { %v274_v60 = vpop.f32.mrf.mxu0 }
 0x154   :  { %v303_v62 = vpop.f32.mrf.mxu1  ;;  %v329_v2 = vadd.f32 %v319_v63, %v274_v60 }
 0x155   :  { %v330_v5 = vadd.f32 %v319_v63, %v303_v62 }
 0x15b   :  { %v277_v0 = vpop.f32.mrf.mxu0 }
 0x15c   :  { %v331_v3 = vadd.f32 %v323_v61, %v277_v0  ;;  %v306_v4 = vpop.f32.mrf.mxu1 }
 0x15d   :  { %v332_v6 = vadd.f32 %v323_v61, %v306_v4 }
 0x15e   :  { %589 = vtanh.f32 %v331_v3 }
 0x15f   :  { %591 = vtanh.f32 %v332_v6 }
 0x160   :  { %593 = vtanh.f32 %v329_v2 }
 0x161   :  { %595 = vtanh.f32 %v330_v5 }
 0x162   :  { %597 = vtanh.f32 %v327_v8 }
 0x163   :  { %599 = vtanh.f32 %v328_v9 }
 0x164   :  { %v590_v12 = vpop.eup %589  ;;  %601 = vtanh.f32 %v325_v10 }
 0x165   :  { %v592_v13 = vpop.eup %591  ;;  %603 = vtanh.f32 %v326_v11  ;;  %370 = vmatpush.msra.mxu2 %v590_v12 }
 0x166   :  { %v594_v15 = vpop.eup %593  ;;  %399 = vmatpush.msra.mxu3 %v592_v13 }
 0x167   :  { %v596_v16 = vpop.eup %595  ;;  %371 = vmatpush.msra.mxu2 %v594_v15 }
 0x168   :  { %v598_v17 = vpop.eup %597  ;;  %400 = vmatpush.msra.mxu3 %v596_v16 }
 0x169   :  { %v600_v18 = vpop.eup %599  ;;  %372 = vmatpush.msra.mxu2 %v598_v17 }
 0x16a   :  { %v602_v21 = vpop.eup %601  ;;  %401 = vmatpush.msra.mxu3 %v600_v18 }
 0x16b   :  { %v604_v22 = vpop.eup %603  ;;  %373 = vmatpush.msra.mxu2 %v602_v21 }
 0x16c   :  { %402 = vmatpush.msra.mxu3 %v604_v22  ;;  %534 = vmatmul.msk.f32.vlgmr.msra.gmra.mxu2 %vm238_vm0, %v530_v19 }
 0x16d   :  { %538 = vmatmul.msk.f32.vlgmr.msra.gmra.mxu3 %vm238_vm0, %v530_v19 }
 0x174   :  { %535 = vmatmul.msk.f32.gmra.mxu2 %vm238_vm0, %v531_v23 }
 0x175   :  { %539 = vmatmul.msk.f32.gmra.mxu3 %vm238_vm0, %v531_v23 }
 0x17c   :  { %536 = vmatmul.msk.f32.gmra.mxu2 %vm238_vm0, %v532_v24 }
 0x17d   :  { %540 = vmatmul.msk.f32.gmra.mxu3 %vm238_vm0, %v532_v24 }
 0x184   :  { %537 = vmatmul.msk.f32.gmra.mxu2 %vm238_vm0, %v533_v27 }
 0x185   :  { %541 = vmatmul.msk.f32.gmra.mxu3 %vm238_vm0, %v533_v27 }
 0x1ef   :  { %v375_v29 = vpop.f32.mrf.mxu2 }
 0x1f0   :  { %v404_v30 = vpop.f32.mrf.mxu3  ;;  %v432_v52 = vadd.f32 %v418_v48, %v375_v29 }
 0x1f1   :  { %v433_v53 = vadd.f32 %v418_v48, %v404_v30 }
 0x1f7   :  { %v378_v32 = vpop.f32.mrf.mxu2 }
 0x1f8   :  { %v407_v33 = vpop.f32.mrf.mxu3  ;;  %v434_v50 = vadd.f32 %v422_v39, %v378_v32 }
 0x1f9   :  { %v435_v51 = vadd.f32 %v422_v39, %v407_v33 }
 0x1ff   :  { %v381_v34 = vpop.f32.mrf.mxu2 }
 0x200   :  { %v410_v36 = vpop.f32.mrf.mxu3  ;;  %v436_v42 = vadd.f32 %v426_v37, %v381_v34 }
 0x201   :  { %v437_v46 = vadd.f32 %v426_v37, %v410_v36 }
 0x207   :  { %v384_v38 = vpop.f32.mrf.mxu2 }
 0x208   :  { %v438_v43 = vadd.f32 %v430_v35, %v384_v38  ;;  %v413_v44 = vpop.f32.mrf.mxu3 }
 0x209   :  { %v439_v47 = vadd.f32 %v430_v35, %v413_v44 }
 0x20a   :  { %605 = vtanh.f32 %v438_v43 }
 0x20b   :  { %607 = vtanh.f32 %v439_v47 }
 0x20c   :  { %609 = vtanh.f32 %v436_v42 }
 0x20d   :  { %611 = vtanh.f32 %v437_v46 }
 0x20e   :  { %613 = vtanh.f32 %v434_v50 }
 0x20f   :  { %615 = vtanh.f32 %v435_v51 }
 0x210   :  { %v606_v54 = vpop.eup %605  ;;  %617 = vtanh.f32 %v432_v52 }
 0x211   :  { %v608_v25 = vpop.eup %607  ;;  %619 = vtanh.f32 %v433_v53  ;;  %466 = vmatpush.msrb.mxu0 %v606_v54 }
 0x212   :  { %v610_v55 = vpop.eup %609  ;;  %486 = vmatpush.msrb.mxu1 %v608_v25 }
 0x213   :  { %v612_v14 = vpop.eup %611  ;;  %467 = vmatpush.msrb.mxu0 %v610_v55 }
 0x214   :  { %v614_v26 = vpop.eup %613  ;;  %487 = vmatpush.msrb.mxu1 %v612_v14 }
 0x215   :  { %v616_v28 = vpop.eup %615  ;;  %468 = vmatpush.msrb.mxu0 %v614_v26 }
 0x216   :  { %v618_v20 = vpop.eup %617  ;;  %488 = vmatpush.msrb.mxu1 %v616_v28 }
 0x217   :  { %v620_v40 = vpop.eup %619  ;;  %469 = vmatpush.msrb.mxu0 %v618_v20 }
 0x218   :  { %489 = vmatpush.msrb.mxu1 %v620_v40  ;;  %542 = vmatmul.msk.f32.vlgmr.msrb.gmra.mxu0 %vm238_vm0, %v448_v31 }
 0x219   :  { %543 = vmatmul.msk.f32.vlgmr.msrb.gmra.mxu1 %vm238_vm0, %v448_v31 }
 0x295   :  { %v471_v45 = vpop.f32.mrf.mxu0 }
 0x296   :  { %v491_v56 = vpop.f32.mrf.mxu1  ;;  %v472_v58 = vadd.f32 %v471_v45, %v450_v41 }
 0x297   :  { %v492_v57 = vadd.f32 %v491_v56, %v450_v41 }
 0x299   :  { %v496_v59 = vrot.slane %v492_v57, 7 }
 0x29b   :  { %v498_v60 = vsel %vm497_vm1, %v472_v58, %v496_v59 }
 0x29c   :  { %504 = vst.msk [vmem:[#allocation6] sm:$0x3] %vm502_vm2, %v498_v60 }
 0x29d   :  { %515 = dma.vmem_to_hbm [thread:$0]  %s511_s10, 32, %s513_s12, [#allocation5]  }
 0x29e   :  { %671 = dma.done.wait [#allocation5], 32  }
 0x29f   :  { %672 = vsyncadd [#allocation5], 4294967264 }
 0x2a0   :  { %520 = vsyncpa [#allocation4], 1 }
 0x2a1   :  { %521 = vsyncpa [#allocation5], 1 }

</bundles_post_ra>
